<compile_context>
chip_gen: v7x
topology: tpu7x:2x2x1
jax: 0.10.0
libtpu: 0.0.40
codegen_flags: <defaults>
</compile_context>

<pallas_src>
import jax
import jax.numpy as jnp
import numpy as np
from jax.experimental import pallas as pl
from jax.experimental.pallas import tpu as pltpu


# ----------------------------- in-kernel helpers -----------------------------

def _erf(x):
    # Abramowitz & Stegun 7.1.26, |err| <= 1.5e-7.  The divide is routed to the
    # EUP slot via pl.reciprocal(approx=True) so it does not load the VALU.
    a1, a2, a3, a4, a5 = (0.254829592, -0.284496736, 1.421413741,
                          -1.453152027, 1.061405429)
    p = 0.3275911
    s = jnp.sign(x)
    ax = jnp.abs(x)
    t = pl.reciprocal(1.0 + p * ax, approx=True)
    poly = t * (a1 + t * (a2 + t * (a3 + t * (a4 + t * a5))))
    return s * (1.0 - poly * jnp.exp(-ax * ax))


def _gelu_exact(x):
    # PyTorch nn.GELU default (approximate='none'): 0.5*x*(1+erf(x/sqrt(2)))
    return 0.5 * x * (1.0 + _erf(x * 0.7071067811865476))


def _gelu_tanh(x):
    # tanh-approx GELU: ~8 VALU ops + 1 EUP tanh.  Error is below bf16 input
    # quantisation noise, so it is used for the bf16 MXU path only.
    c = 0.7978845608028654  # sqrt(2/pi)
    return 0.5 * x * (1.0 + jnp.tanh(c * (x + 0.044715 * x * x * x)))


# --------------------------------- kernel -------------------------------------

def _make_mlp_kernel(use_tanh_gelu):
    def kernel(x_ref, w1_ref, b1_ref, w2_ref, b2_ref, o_ref):
        # fc1 on the MXU with f32 accumulation.
        h = jnp.dot(x_ref[...], w1_ref[...], preferred_element_type=jnp.float32)
        # bias + GELU in f32 (VPU/EUP).
        h = h + b1_ref[...]
        h = _gelu_tanh(h) if use_tanh_gelu else _gelu_exact(h)
        # fc2: feed the MXU in the weights' compute dtype (bf16 or f32).
        h = h.astype(w2_ref.dtype)
        y = jnp.dot(h, w2_ref[...], preferred_element_type=jnp.float32)
        o_ref[...] = (y + b2_ref[...]).astype(o_ref.dtype)
    return kernel


# --------------------------------- wrapper ------------------------------------

def _round_up(v, m):
    return (v + m - 1) // m * m


def _cdiv(a, b):
    return -(-a // b)


def prepare_mlp_params(params, *, compute_dtype=jnp.bfloat16, lane=128):
    """Pad (lane-dense) and cast the weights ONCE; reuse across forward calls."""
    w1, b1, w2, b2 = params["w1"], params["b1"], params["w2"], params["b2"]
    din, hidden = w1.shape
    dout = w2.shape[1]
    din_p, hid_p, dout_p = (_round_up(d, lane) for d in (din, hidden, dout))
    return {
        "w1": jnp.pad(w1, ((0, din_p - din), (0, hid_p - hidden))).astype(compute_dtype),
        "w2": jnp.pad(w2, ((0, hid_p - hidden), (0, dout_p - dout))).astype(compute_dtype),
        "b1": jnp.pad(b1.astype(jnp.float32).reshape(1, -1),
                      ((0, 0), (0, hid_p - hidden))),
        "b2": jnp.pad(b2.astype(jnp.float32).reshape(1, -1),
                      ((0, 0), (0, dout_p - dout))),
        "dims": (din, hidden, dout),
        "padded_dims": (din_p, hid_p, dout_p),
        "compute_dtype": jnp.dtype(compute_dtype),
    }


def mlp_forward(x, params=None, *, prepared=None, block_rows=512,
                compute_dtype=jnp.bfloat16, lane=128,
                single_buffer_weights=True, out_dtype=None):
    """Mlp forward.  x: (..., in_features).  Returns (..., out_features)."""
    if prepared is None:
        prepared = prepare_mlp_params(params, compute_dtype=compute_dtype, lane=lane)
    cdt = prepared["compute_dtype"]
    din, hidden, dout = prepared["dims"]
    din_p, hid_p, dout_p = prepared["padded_dims"]
    out_dtype = out_dtype or x.dtype

    lead = x.shape[:-1]
    rows = int(np.prod(lead)) if lead else 1

    # Row tile: minimise padding, align to sublane packing (16 for bf16, 8 f32).
    row_align = 16 if cdt.itemsize == 2 else 8
    rows_a = _round_up(rows, row_align)
    if rows_a <= block_rows:
        tm = rows_a
    else:
        tm = _round_up(_cdiv(rows, _cdiv(rows, block_rows)), row_align)
    n_tiles = _cdiv(rows, tm)
    rows_p = n_tiles * tm

    xf = x.reshape(rows, din)
    xf = jnp.pad(xf, ((0, rows_p - rows), (0, din_p - din))).astype(cdt)

    # ---- VMEM budgeting (generation-aware) -----------------------------------
    itm = cdt.itemsize
    out_itm = jnp.dtype(out_dtype).itemsize
    wbuf = 1 if single_buffer_weights else 2
    est = (2 * tm * din_p * itm                     # streamed x tiles (2-buf)
           + 2 * tm * dout_p * out_itm              # streamed out tiles (2-buf)
           + wbuf * (din_p * hid_p + hid_p * dout_p) * itm   # resident weights
           + wbuf * (hid_p + dout_p) * 4            # resident biases (f32)
           + tm * hid_p * (4 + itm))                # f32 hidden + cast copy
    try:
        vmem_cap = int(pltpu.get_tpu_info().vmem_capacity_bytes)
    except Exception:  # conservative fallback if the query is unavailable
        vmem_cap = 128 * 1024 * 1024
    cp_kwargs = dict(dimension_semantics=("parallel",))
    # Smallest per-generation default scoped limit is ~16 MiB (v5e); raise the
    # limit whenever we might exceed it, clamped to 90% of physical VMEM.
    if est > 14 * 1024 * 1024:
        cp_kwargs["vmem_limit_bytes"] = int(min(est * 5 // 4, vmem_cap * 9 // 10))

    kernel = _make_mlp_kernel(use_tanh_gelu=(itm == 2))

    def build_call(single_buf):
        def wspec(shape):
            imap = lambda i, _n=len(shape): (0,) * _n
            if single_buf:
                # Grid-invariant blocks: double-buffering buys nothing.
                return pl.BlockSpec(shape, imap,
                                    pipeline_mode=pl.Buffered(buffer_count=1))
            return pl.BlockSpec(shape, imap)

        return pl.pallas_call(
            kernel,
            out_shape=jax.ShapeDtypeStruct((rows_p, dout_p), out_dtype),
            grid=(n_tiles,),
            in_specs=[
                pl.BlockSpec((tm, din_p), lambda i: (i, 0)),   # x tile (streams)
                wspec((din_p, hid_p)),                         # W1 (resident)
                wspec((1, hid_p)),                             # b1
                wspec((hid_p, dout_p)),                        # W2 (resident)
                wspec((1, dout_p)),                            # b2
            ],
            out_specs=pl.BlockSpec((tm, dout_p), lambda i: (i, 0)),
            compiler_params=pltpu.CompilerParams(**cp_kwargs),
        )

    args = (xf, prepared["w1"], prepared["b1"], prepared["w2"], prepared["b2"])
    try:
        out = build_call(single_buffer_weights)(*args)
    except Exception:
        # Fallback: some JAX versions reject Buffered(1); rerun double-buffered.
        out = build_call(False)(*args)

    return out[:rows, :dout].reshape(*lead, dout)


# --------------------------- pure-JAX reference --------------------------------

def mlp_ref(x, params):
    h = jax.nn.gelu(x @ params["w1"] + params["b1"], approximate=False)
    return h @ params["w2"] + params["b2"]


# ----------------------------------- main --------------------------------------

if __name__ == "__main__":
    # Small shapes consistent with the module: x (B, N, in_features),
    # hidden_features = 4 * in_features (typical ViT mlp_ratio).
    B, N, DIN = 2, 8, 32
    HID = 4 * DIN          # 128
    DOUT = DIN

    key = jax.random.PRNGKey(0)
    kx, k1, k2, k3, k4 = jax.random.split(key, 5)
    x = jax.random.normal(kx, (B, N, DIN), jnp.float32)
    params = {
        "w1": 0.1 * jax.random.normal(k1, (DIN, HID), jnp.float32),
        "b1": 0.1 * jax.random.normal(k2, (HID,), jnp.float32),
        "w2": 0.1 * jax.random.normal(k3, (HID, DOUT), jnp.float32),
        "b2": 0.1 * jax.random.normal(k4, (DOUT,), jnp.float32),
    }

    ref = jax.block_until_ready(mlp_ref(x, params))

    # Default path: bf16 MXU inputs, f32 accumulation, tanh-approx GELU,
    # weights pre-padded/pre-cast once (hoisted out of the forward).
    prep_bf16 = prepare_mlp_params(params, compute_dtype=jnp.bfloat16)
    out_bf16 = jax.block_until_ready(mlp_forward(x, prepared=prep_bf16))
    np.testing.assert_allclose(np.asarray(out_bf16), np.asarray(ref),
                               rtol=5e-2, atol=5e-2)

    # f32 exact-erf GELU path (bit-closer to the torch module).
    out_f32 = jax.block_until_ready(
        mlp_forward(x, params, compute_dtype=jnp.float32))
    np.testing.assert_allclose(np.asarray(out_f32), np.asarray(ref),
                               rtol=2e-2, atol=2e-2)

    print("KERNEL_OK")
</pallas_src>

<mosaic_0001>
module attributes {stable_mosaic.version = 11 : i64} {
  func.func @kernel(%arg0: i32, %arg1: memref<16x128xbf16, #tpu.memory_space<vmem>>, %arg2: memref<128x128xbf16, #tpu.memory_space<vmem>>, %arg3: memref<1x128xf32, #tpu.memory_space<vmem>>, %arg4: memref<128x128xbf16, #tpu.memory_space<vmem>>, %arg5: memref<1x128xf32, #tpu.memory_space<vmem>>, %arg6: memref<16x128xf32, #tpu.memory_space<vmem>>) attributes {dimension_semantics = [#tpu.dimension_semantics<parallel>], iteration_bounds = array<i64: 1>, scalar_prefetch = 0 : i64, scratch_operands = 0 : i64, tpu.core_type = #tpu.core_type<tc>, window_params = [{transform_indices = @transform_0, window_bounds = array<i64: 16, 128>}, {pipeline_mode = #tpu.pipeline_mode<synchronous>, transform_indices = @transform_1, window_bounds = array<i64: 128, 128>}, {pipeline_mode = #tpu.pipeline_mode<synchronous>, transform_indices = @transform_2, window_bounds = array<i64: 1, 128>}, {pipeline_mode = #tpu.pipeline_mode<synchronous>, transform_indices = @transform_3, window_bounds = array<i64: 128, 128>}, {pipeline_mode = #tpu.pipeline_mode<synchronous>, transform_indices = @transform_4, window_bounds = array<i64: 1, 128>}, {transform_indices = @transform_5, window_bounds = array<i64: 16, 128>}]} {
    %c0 = arith.constant 0 : index
    %c0_0 = arith.constant 0 : index
    %0 = vector.load %arg1[%c0, %c0_0] : memref<16x128xbf16, #tpu.memory_space<vmem>>, vector<16x128xbf16>
    %c0_1 = arith.constant 0 : index
    %c0_2 = arith.constant 0 : index
    %1 = vector.load %arg2[%c0_1, %c0_2] : memref<128x128xbf16, #tpu.memory_space<vmem>>, vector<128x128xbf16>
    %cst = arith.constant dense<0.000000e+00> : vector<16x128xf32>
    %2 = tpu.matmul %0, %1, %cst {dimension_numbers = #tpu.dot_dimension_numbers<[1], [0], [0], [1], [0, 0, 1, 1], [], []>} : vector<16x128xbf16>, vector<128x128xbf16>, vector<16x128xf32> -> vector<16x128xf32>
    %c0_3 = arith.constant 0 : index
    %c0_4 = arith.constant 0 : index
    %3 = vector.load %arg3[%c0_3, %c0_4] : memref<1x128xf32, #tpu.memory_space<vmem>>, vector<1x128xf32>
    %4 = vector.broadcast %3 : vector<1x128xf32> to vector<16x128xf32>
    %5 = arith.addf %2, %4 : vector<16x128xf32>
    %cst_5 = arith.constant 5.000000e-01 : f32
    %6 = vector.broadcast %cst_5 : f32 to vector<16x128xf32>
    %7 = arith.mulf %6, %5 : vector<16x128xf32>
    %cst_6 = arith.constant 4.471500e-02 : f32
    %8 = vector.broadcast %cst_6 : f32 to vector<16x128xf32>
    %9 = arith.mulf %8, %5 : vector<16x128xf32>
    %10 = arith.mulf %9, %5 : vector<16x128xf32>
    %11 = arith.mulf %10, %5 : vector<16x128xf32>
    %12 = arith.addf %5, %11 : vector<16x128xf32>
    %cst_7 = arith.constant 0.797884583 : f32
    %13 = vector.broadcast %cst_7 : f32 to vector<16x128xf32>
    %14 = arith.mulf %13, %12 : vector<16x128xf32>
    %15 = math.tanh %14 : vector<16x128xf32>
    %cst_8 = arith.constant 1.000000e+00 : f32
    %16 = vector.broadcast %cst_8 : f32 to vector<16x128xf32>
    %17 = arith.addf %16, %15 : vector<16x128xf32>
    %18 = arith.mulf %7, %17 : vector<16x128xf32>
    %19 = arith.truncf %18 : vector<16x128xf32> to vector<16x128xbf16>
    %c0_9 = arith.constant 0 : index
    %c0_10 = arith.constant 0 : index
    %20 = vector.load %arg4[%c0_9, %c0_10] : memref<128x128xbf16, #tpu.memory_space<vmem>>, vector<128x128xbf16>
    %cst_11 = arith.constant dense<0.000000e+00> : vector<16x128xf32>
    %21 = tpu.matmul %19, %20, %cst_11 {dimension_numbers = #tpu.dot_dimension_numbers<[1], [0], [0], [1], [0, 0, 1, 1], [], []>} : vector<16x128xbf16>, vector<128x128xbf16>, vector<16x128xf32> -> vector<16x128xf32>
    %c0_12 = arith.constant 0 : index
    %c0_13 = arith.constant 0 : index
    %22 = vector.load %arg5[%c0_12, %c0_13] : memref<1x128xf32, #tpu.memory_space<vmem>>, vector<1x128xf32>
    %23 = vector.broadcast %22 : vector<1x128xf32> to vector<16x128xf32>
    %24 = arith.addf %21, %23 : vector<16x128xf32>
    %c0_14 = arith.constant 0 : index
    %c0_15 = arith.constant 0 : index
    %25 = vector.load %arg6[%c0_14, %c0_15] : memref<16x128xf32, #tpu.memory_space<vmem>>, vector<16x128xf32>
    tpu.vector_store %arg6[%c0_14, %c0_15], %24 {strides = array<i32>} : memref<16x128xf32, #tpu.memory_space<vmem>>, vector<16x128xf32>,
    return
  }
  func.func @transform_0(%arg0: i32) -> (i32, i32) {
    %c0_i32 = arith.constant 0 : i32
    %c0_i32_0 = arith.constant 0 : i32
    return %arg0, %c0_i32 : i32, i32
  }
  func.func @transform_1(%arg0: i32) -> (i32, i32) {
    %c0_i32 = arith.constant 0 : i32
    %c0_i32_0 = arith.constant 0 : i32
    %c0_i32_1 = arith.constant 0 : i32
    return %c0_i32, %c0_i32_0 : i32, i32
  }
  func.func @transform_2(%arg0: i32) -> (i32, i32) {
    %c0_i32 = arith.constant 0 : i32
    %c0_i32_0 = arith.constant 0 : i32
    %c0_i32_1 = arith.constant 0 : i32
    return %c0_i32, %c0_i32_0 : i32, i32
  }
  func.func @transform_3(%arg0: i32) -> (i32, i32) {
    %c0_i32 = arith.constant 0 : i32
    %c0_i32_0 = arith.constant 0 : i32
    %c0_i32_1 = arith.constant 0 : i32
    return %c0_i32, %c0_i32_0 : i32, i32
  }
  func.func @transform_4(%arg0: i32) -> (i32, i32) {
    %c0_i32 = arith.constant 0 : i32
    %c0_i32_0 = arith.constant 0 : i32
    %c0_i32_1 = arith.constant 0 : i32
    return %c0_i32, %c0_i32_0 : i32, i32
  }
  func.func @transform_5(%arg0: i32) -> (i32, i32) {
    %c0_i32 = arith.constant 0 : i32
    %c0_i32_0 = arith.constant 0 : i32
    return %arg0, %c0_i32 : i32, i32
  }
}

module attributes {stable_mosaic.version = 11 : i64} {
  func.func @kernel(%arg0: i32, %arg1: memref<16x128xbf16, #tpu.memory_space<vmem>>, %arg2: memref<128x128xbf16, #tpu.memory_space<vmem>>, %arg3: memref<1x128xf32, #tpu.memory_space<vmem>>, %arg4: memref<128x128xbf16, #tpu.memory_space<vmem>>, %arg5: memref<1x128xf32, #tpu.memory_space<vmem>>, %arg6: memref<16x128xf32, #tpu.memory_space<vmem>>) attributes {dimension_semantics = [#tpu.dimension_semantics<parallel>], iteration_bounds = array<i64: 1>, scalar_prefetch = 0 : i64, scratch_operands = 0 : i64, tpu.core_type = #tpu.core_type<tc>, window_params = [{transform_indices = @transform_0, window_bounds = array<i64: 16, 128>}, {pipeline_mode = #tpu.pipeline_mode<synchronous>, transform_indices = @transform_1, window_bounds = array<i64: 128, 128>}, {pipeline_mode = #tpu.pipeline_mode<synchronous>, transform_indices = @transform_2, window_bounds = array<i64: 1, 128>}, {pipeline_mode = #tpu.pipeline_mode<synchronous>, transform_indices = @transform_3, window_bounds = array<i64: 128, 128>}, {pipeline_mode = #tpu.pipeline_mode<synchronous>, transform_indices = @transform_4, window_bounds = array<i64: 1, 128>}, {transform_indices = @transform_5, window_bounds = array<i64: 16, 128>}]} {
    %c0 = arith.constant 0 : index
    %c0_0 = arith.constant 0 : index
    %0 = vector.load %arg1[%c0, %c0_0] : memref<16x128xbf16, #tpu.memory_space<vmem>>, vector<16x128xbf16>
    %c0_1 = arith.constant 0 : index
    %c0_2 = arith.constant 0 : index
    %1 = vector.load %arg2[%c0_1, %c0_2] : memref<128x128xbf16, #tpu.memory_space<vmem>>, vector<128x128xbf16>
    %cst = arith.constant dense<0.000000e+00> : vector<16x128xf32>
    %2 = tpu.matmul %0, %1, %cst {dimension_numbers = #tpu.dot_dimension_numbers<[1], [0], [0], [1], [0, 0, 1, 1], [], []>} : vector<16x128xbf16>, vector<128x128xbf16>, vector<16x128xf32> -> vector<16x128xf32>
    %c0_3 = arith.constant 0 : index
    %c0_4 = arith.constant 0 : index
    %3 = vector.load %arg3[%c0_3, %c0_4] : memref<1x128xf32, #tpu.memory_space<vmem>>, vector<1x128xf32>
    %4 = vector.broadcast %3 : vector<1x128xf32> to vector<16x128xf32>
    %5 = arith.addf %2, %4 : vector<16x128xf32>
    %cst_5 = arith.constant 5.000000e-01 : f32
    %6 = vector.broadcast %cst_5 : f32 to vector<16x128xf32>
    %7 = arith.mulf %6, %5 : vector<16x128xf32>
    %cst_6 = arith.constant 4.471500e-02 : f32
    %8 = vector.broadcast %cst_6 : f32 to vector<16x128xf32>
    %9 = arith.mulf %8, %5 : vector<16x128xf32>
    %10 = arith.mulf %9, %5 : vector<16x128xf32>
    %11 = arith.mulf %10, %5 : vector<16x128xf32>
    %12 = arith.addf %5, %11 : vector<16x128xf32>
    %cst_7 = arith.constant 0.797884583 : f32
    %13 = vector.broadcast %cst_7 : f32 to vector<16x128xf32>
    %14 = arith.mulf %13, %12 : vector<16x128xf32>
    %15 = math.tanh %14 : vector<16x128xf32>
    %cst_8 = arith.constant 1.000000e+00 : f32
    %16 = vector.broadcast %cst_8 : f32 to vector<16x128xf32>
    %17 = arith.addf %16, %15 : vector<16x128xf32>
    %18 = arith.mulf %7, %17 : vector<16x128xf32>
    %19 = arith.truncf %18 : vector<16x128xf32> to vector<16x128xbf16>
    %c0_9 = arith.constant 0 : index
    %c0_10 = arith.constant 0 : index
    %20 = vector.load %arg4[%c0_9, %c0_10] : memref<128x128xbf16, #tpu.memory_space<vmem>>, vector<128x128xbf16>
    %cst_11 = arith.constant dense<0.000000e+00> : vector<16x128xf32>
    %21 = tpu.matmul %19, %20, %cst_11 {dimension_numbers = #tpu.dot_dimension_numbers<[1], [0], [0], [1], [0, 0, 1, 1], [], []>} : vector<16x128xbf16>, vector<128x128xbf16>, vector<16x128xf32> -> vector<16x128xf32>
    %c0_12 = arith.constant 0 : index
    %c0_13 = arith.constant 0 : index
    %22 = vector.load %arg5[%c0_12, %c0_13] : memref<1x128xf32, #tpu.memory_space<vmem>>, vector<1x128xf32>
    %23 = vector.broadcast %22 : vector<1x128xf32> to vector<16x128xf32>
    %24 = arith.addf %21, %23 : vector<16x128xf32>
    %c0_14 = arith.constant 0 : index
    %c0_15 = arith.constant 0 : index
    %25 = vector.load %arg6[%c0_14, %c0_15] : memref<16x128xf32, #tpu.memory_space<vmem>>, vector<16x128xf32>
    tpu.vector_store %arg6[%c0_14, %c0_15], %24 {strides = array<i32>} : memref<16x128xf32, #tpu.memory_space<vmem>>, vector<16x128xf32>,
    return
  }
  func.func @transform_0(%arg0: i32) -> (i32, i32) {
    %c0_i32 = arith.constant 0 : i32
    %c0_i32_0 = arith.constant 0 : i32
    return %arg0, %c0_i32 : i32, i32
  }
  func.func @transform_1(%arg0: i32) -> (i32, i32) {
    %c0_i32 = arith.constant 0 : i32
    %c0_i32_0 = arith.constant 0 : i32
    %c0_i32_1 = arith.constant 0 : i32
    return %c0_i32, %c0_i32_0 : i32, i32
  }
  func.func @transform_2(%arg0: i32) -> (i32, i32) {
    %c0_i32 = arith.constant 0 : i32
    %c0_i32_0 = arith.constant 0 : i32
    %c0_i32_1 = arith.constant 0 : i32
    return %c0_i32, %c0_i32_0 : i32, i32
  }
  func.func @transform_3(%arg0: i32) -> (i32, i32) {
    %c0_i32 = arith.constant 0 : i32
    %c0_i32_0 = arith.constant 0 : i32
    %c0_i32_1 = arith.constant 0 : i32
    return %c0_i32, %c0_i32_0 : i32, i32
  }
  func.func @transform_4(%arg0: i32) -> (i32, i32) {
    %c0_i32 = arith.constant 0 : i32
    %c0_i32_0 = arith.constant 0 : i32
    %c0_i32_1 = arith.constant 0 : i32
    return %c0_i32, %c0_i32_0 : i32, i32
  }
  func.func @transform_5(%arg0: i32) -> (i32, i32) {
    %c0_i32 = arith.constant 0 : i32
    %c0_i32_0 = arith.constant 0 : i32
    return %arg0, %c0_i32 : i32, i32
  }
}

</mosaic_0001>

<bundles_post_ra>
// kernel: tpu_custom_call.1
= control target key start
LH: loop header
LB: loop body
LE: loop exit
PB: predicated region body
PF: predicated region fallthrough
CT: control target
= control target key end

     0   :  { %10 = vsyncpa [#allocation3], 0  ;;  %s646_s0 = inlined_call_operand.hbm [shape: bf16[16,128], index: 0, kind: input, shape index: {}]   ;;  %s647_s1 = inlined_call_operand.hbm [shape: bf16[128,128], index: 1, kind: input, shape index: {}]   ;;  %s648_s2 = inlined_call_operand.vmem [shape: f32[1,128], index: 2, kind: input, shape index: {}]   ;;  %s649_s3 = inlined_call_operand.hbm [shape: bf16[128,128], index: 3, kind: input, shape index: {}]   ;;  %s650_s4 = inlined_call_operand.vmem [shape: f32[1,128], index: 4, kind: input, shape index: {}]   ;;  %s651_s5 = inlined_call_operand.hbm [shape: f32[16,128], index: 5, kind: output, shape index: {}]  }
   0x1   :  { %11 = vsyncpa [#allocation6], 0 }
   0x2   :  { %12 = vsyncpa [#allocation4], 0  ;;  %s536_s18 = smov [#allocation5]   ;;  %s537_s20 = smov [#allocation2]  }
   0x3   :  { %s30_s19 = sshll.u32 %s536_s18, 4  ;;  %s18_s21 = sshll.u32 %s537_s20, 4  ;;  %s31_s19 = int_to_ptr.vmem [resolvable:$true] %s30_s19  ;;  %s576_s21 = int_to_ptr.vmem [resolvable:$true] %s18_s21 }
   0x4   :  { %s442_s24 = scalar_lea.hbm %s647_s1, 1024 }
   0x5   :  { %p443_p0 = scmp.ne.s32.totalorder %s647_s1, %s442_s24  ;;  %p446_p1 = scmp.lt.u32.totalorder %s442_s24, %s647_s1 }
   0x7   :  { %p448_p2 = pnand %p446_p1, %p443_p0 }
   0x9   :  { %451 = shalt.err (!%p448_p2)
}
   0xa   :  { %s452_s29 = scalar_lea.vmem %s31_s19, 1024  ;;  %p457_p4 = scmp.lt.s32.totalorder %s31_s19, %s31_s19 }
   0xb   :  { %p453_p3 = scmp.ne.s32.totalorder %s31_s19, %s452_s29  ;;  %p458_p5 = scmp.lt.s32.totalorder %s452_s29, %s452_s29 }
   0xd   :  { %p459_p6 = por %p458_p5, %p457_p4 }
   0xf   :  { %p460_p7 = pnand %p459_p6, %p453_p3 }
  0x11   :  { %463 = shalt.err (!%p460_p7)
}
  0x12   :  { %s538_s30 = smov 64   ;;  %s539_s6 = smov 4  }
  0x13   :  { %36 = dma.hbm_to_vmem [thread:$0]  %s647_s1, 1024, %s31_s19, [#allocation6], %s538_s30, %s538_s30, %s539_s6  }
  0x14   :  { %s464_s11 = scalar_lea.hbm %s646_s0, 128 }
  0x15   :  { %p465_p8 = scmp.ne.s32.totalorder %s646_s0, %s464_s11  ;;  %p468_p9 = scmp.lt.u32.totalorder %s464_s11, %s646_s0 }
  0x17   :  { %p470_p10 = pnand %p468_p9, %p465_p8 }
  0x19   :  { %473 = shalt.err (!%p470_p10)
}
  0x1a   :  { %s474_s16 = scalar_lea.vmem %s576_s21, 128  ;;  %p479_p12 = scmp.lt.s32.totalorder %s576_s21, %s576_s21 }
  0x1b   :  { %p475_p11 = scmp.ne.s32.totalorder %s576_s21, %s474_s16  ;;  %p480_p13 = scmp.lt.s32.totalorder %s474_s16, %s474_s16 }
  0x1d   :  { %p481_p0 = por %p480_p13, %p479_p12 }
  0x1f   :  { %p482_p1 = pnand %p481_p0, %p475_p11 }
  0x21   :  { %485 = shalt.err (!%p482_p1)
}
  0x22   :  { %24 = dma.hbm_to_vmem [thread:$0]  %s646_s0, 128, %s576_s21, [#allocation3], %s538_s30, %s538_s30, %s539_s6  }
  0x23   :  { %s540_s18 = smov [#allocation7]   ;;  %s486_s23 = scalar_lea.hbm %s649_s3, 1024 }
  0x24   :  { %s44_s19 = sshll.u32 %s540_s18, 4  ;;  %p487_p2 = scmp.ne.s32.totalorder %s649_s3, %s486_s23  ;;  %s45_s19 = int_to_ptr.vmem [resolvable:$true] %s44_s19 }
  0x25   :  { %p490_p3 = scmp.lt.u32.totalorder %s486_s23, %s649_s3 }
  0x27   :  { %p492_p4 = pnand %p490_p3, %p487_p2 }
  0x29   :  { %495 = shalt.err (!%p492_p4)
}
  0x2a   :  { %s496_s28 = scalar_lea.vmem %s45_s19, 1024  ;;  %p501_p6 = scmp.lt.s32.totalorder %s45_s19, %s45_s19 }
  0x2b   :  { %p497_p5 = scmp.ne.s32.totalorder %s45_s19, %s496_s28  ;;  %p502_p7 = scmp.lt.s32.totalorder %s496_s28, %s496_s28 }
  0x2d   :  { %p503_p8 = por %p502_p7, %p501_p6 }
  0x2f   :  { %p504_p9 = pnand %p503_p8, %p497_p5 }
  0x31   :  { %507 = shalt.err (!%p504_p9)
}
  0x32   :  { %50 = dma.hbm_to_vmem [thread:$0]  %s649_s3, 1024, %s45_s19, [#allocation6], %s538_s30, %s538_s30, %s539_s6  }
  0x33   :  { %530 = dma.done.wait [#allocation3], 128  }
  0x34   :  { %531 = vsyncadd [#allocation3], 4294967168 }
  0x35   :  { %532 = dma.done.wait [#allocation6], 2048  }
  0x36   :  { %533 = vsyncadd [#allocation6], 4294965248  ;;  %v541_v0 = vmov 0.0   ;;  %vm542_vm0 = vmmov 0   ;;  %v421_v1 = vld [vmem:[#allocation5] sm:$0xff]   ;;  %v422_v2 = vld [vmem:[#allocation5 + $0x8] sm:$0xff]  }
  0x37   :  { %371 = vmatprep.subr.bf16.mxu0 %v541_v0  ;;  %387 = vmatprep.mubr.msk.bf16.mxu0 %vm542_vm0, %v541_v0  ;;  %v423_v3 = vld [vmem:[#allocation5 + $0x10] sm:$0xff]   ;;  %v424_v4 = vld [vmem:[#allocation5 + $0x18] sm:$0xff]   ;;  %v425_v5 = vld [vmem:[#allocation5 + $0x20] sm:$0xff]   ;;  %s543_s6 = smov [#allocation8]  }
  0x38   :  { %391 = vmatprep.subr.bf16.mxu1 %v541_v0  ;;  %407 = vmatprep.mubr.msk.bf16.mxu1 %vm542_vm0, %v541_v0  ;;  %v426_v6 = vld [vmem:[#allocation5 + $0x28] sm:$0xff]   ;;  %v427_v7 = vld [vmem:[#allocation5 + $0x30] sm:$0xff]   ;;  %v428_v8 = vld [vmem:[#allocation5 + $0x38] sm:$0xff]   ;;  %s321_s7 = sshll.u32 %s543_s6, 4  ;;  %s322_s7 = int_to_ptr.vmem [resolvable:$true] %s321_s7 }
  0x39   :  { %372 = vmatpush3.bf16.msra.mxu0 %v421_v1  ;;  %v429_v9 = vld [vmem:[#allocation2] sm:$0xff]   ;;  %v430_v10 = vld [vmem:[#allocation7] sm:$0xff]   ;;  %v431_v11 = vld [vmem:[#allocation7 + $0x8] sm:$0xff]   ;;  %s508_s8 = scalar_lea.vmem %s322_s7, 256  ;;  %p513_p11 = scmp.lt.s32.totalorder %s322_s7, %s322_s7 }
  0x3a   :  { %373 = vmatprep.subr.bf16.mxu0 %v541_v0  ;;  %392 = vmatpush3.bf16.msra.mxu1 %v430_v10  ;;  %v432_v12 = vld [vmem:[#allocation7 + $0x10] sm:$0xff]   ;;  %v433_v13 = vld [vmem:[#allocation7 + $0x18] sm:$0xff]   ;;  %v434_v14 = vld [vmem:[#allocation7 + $0x20] sm:$0xff]   ;;  %p509_p10 = scmp.ne.s32.totalorder %s322_s7, %s508_s8  ;;  %p514_p12 = scmp.lt.s32.totalorder %s508_s8, %s508_s8 }
  0x3b   :  { %393 = vmatprep.subr.bf16.mxu1 %v541_v0  ;;  %v435_v15 = vld [vmem:[#allocation7 + $0x28] sm:$0xff]   ;;  %v436_v16 = vld [vmem:[#allocation7 + $0x30] sm:$0xff]   ;;  %v437_v17 = vld [vmem:[#allocation7 + $0x38] sm:$0xff]  }
  0x3c   :  { %v334_v18 = vld [vmem:[%s648_s2] ss:$0 sm:$0xff]  ;;  %p515_p13 = por %p514_p12, %p513_p11 }
  0x3d   :  { %374 = vmatpush3.bf16.msra.mxu0 %v422_v2  ;;  %v344_v44 = vld [vmem:[%s650_s4] ss:$0 sm:$0xff] }
  0x3e   :  { %375 = vmatprep.subr.bf16.mxu0 %v541_v0  ;;  %394 = vmatpush3.bf16.msra.mxu1 %v431_v11  ;;  %p516_p0 = pnand %p515_p13, %p509_p10 }
  0x3f   :  { %395 = vmatprep.subr.bf16.mxu1 %v541_v0 }
  0x41   :  { %376 = vmatpush3.bf16.msra.mxu0 %v423_v3 }
  0x42   :  { %377 = vmatprep.subr.bf16.mxu0 %v541_v0  ;;  %396 = vmatpush3.bf16.msra.mxu1 %v432_v12 }
  0x43   :  { %397 = vmatprep.subr.bf16.mxu1 %v541_v0 }
  0x45   :  { %378 = vmatpush3.bf16.msra.mxu0 %v424_v4 }
  0x46   :  { %379 = vmatprep.subr.bf16.mxu0 %v541_v0  ;;  %398 = vmatpush3.bf16.msra.mxu1 %v433_v13 }
  0x47   :  { %399 = vmatprep.subr.bf16.mxu1 %v541_v0 }
  0x49   :  { %380 = vmatpush3.bf16.msra.mxu0 %v425_v5 }
  0x4a   :  { %381 = vmatprep.subr.bf16.mxu0 %v541_v0  ;;  %400 = vmatpush3.bf16.msra.mxu1 %v434_v14 }
  0x4b   :  { %401 = vmatprep.subr.bf16.mxu1 %v541_v0 }
  0x4d   :  { %382 = vmatpush3.bf16.msra.mxu0 %v426_v6 }
  0x4e   :  { %383 = vmatprep.subr.bf16.mxu0 %v541_v0  ;;  %402 = vmatpush3.bf16.msra.mxu1 %v435_v15 }
  0x4f   :  { %403 = vmatprep.subr.bf16.mxu1 %v541_v0 }
  0x51   :  { %384 = vmatpush3.bf16.msra.mxu0 %v427_v7 }
  0x52   :  { %385 = vmatprep.subr.bf16.mxu0 %v541_v0  ;;  %404 = vmatpush3.bf16.msra.mxu1 %v436_v16 }
  0x53   :  { %405 = vmatprep.subr.bf16.mxu1 %v541_v0 }
  0x55   :  { %386 = vmatpush3.bf16.msra.mxu0 %v428_v8 }
  0x56   :  { %406 = vmatpush3.bf16.msra.mxu1 %v437_v17 }
  0x58   :  { %388 = vmatmul.mubr.bf16.vlgmr.msra.gmra.mrb[0].mxu0 %v429_v9 }
 0x12b   :  { %v176_v19 = vpop.f32.mrb[0].mxu0 }
 0x12c   :  { %v177_v20 = vadd.f32 %v334_v18, %v176_v19  ;;  %v389_v21 = vpop.f32.mrb[1].mxu0 }
 0x12d   :  { %v179_v22 = vpop.f32.mrb[2].mxu0 }
 0x12e   :  { %v185_v23 = vmul.f32 0.044715, %v177_v20  ;;  %v180_v24 = vadd.f32 %v334_v18, %v179_v22  ;;  %v390_v25 = vpop.f32.mrb[3].mxu0  ;;  %v183_v38 = vmul.f32 0.5, %v177_v20 }
 0x130   :  { %v187_v26 = vmul.f32 %v185_v23, %v177_v20  ;;  %v186_v27 = vmul.f32 0.044715, %v180_v24  ;;  %v184_v39 = vmul.f32 0.5, %v180_v24 }
 0x132   :  { %v189_v28 = vmul.f32 %v187_v26, %v177_v20  ;;  %v188_v29 = vmul.f32 %v186_v27, %v180_v24 }
 0x134   :  { %v190_v30 = vmul.f32 %v188_v29, %v180_v24  ;;  %v191_v31 = vadd.f32 %v189_v28, %v177_v20 }
 0x136   :  { %v192_v32 = vadd.f32 %v190_v30, %v180_v24  ;;  %v193_v33 = vmul.f32 0.7978846, %v191_v31 }
 0x138   :  { %v194_v34 = vmul.f32 0.7978846, %v192_v32  ;;  %438 = vtanh.f32 %v193_v33 }
 0x13a   :  { %440 = vtanh.f32 %v194_v34 }
 0x142   :  { %v439_v35 = vpop.eup %438 }
 0x143   :  { %v197_v36 = vadd.f32 1.0, %v439_v35 }
 0x144   :  { %v441_v37 = vpop.eup %440 }
 0x145   :  { %v198_v40 = vadd.f32 1.0, %v441_v37  ;;  %v199_v41 = vmul.f32 %v197_v36, %v183_v38 }
 0x147   :  { %v200_v42 = vmul.f32 %v198_v40, %v184_v39 }
 0x149   :  { %v201_v43 = vpack.c.bf16 %v200_v42, %v199_v41 }
 0x14b   :  { %408 = vmatmul.mubr.bf16.vlgmr.msra.gmra.mrb[0].mxu1 %v201_v43 }
 0x21e   :  { %v307_v45 = vpop.f32.mrb[0].mxu1 }
 0x21f   :  { %v308_v46 = vadd.f32 %v344_v44, %v307_v45  ;;  %v409_v47 = vpop.f32.mrb[1].mxu1 }
 0x220   :  { %v310_v48 = vpop.f32.mrb[2].mxu1 }
 0x221   :  { %314 = vst [vmem:[#allocation8] sm:$0xff] %v308_v46  ;;  %v311_v49 = vadd.f32 %v344_v44, %v310_v48  ;;  %v410_v50 = vpop.f32.mrb[3].mxu1 }
 0x223   :  { %315 = vst [vmem:[#allocation8 + $0x8] sm:$0xff] %v311_v49 }
 0x224   :  { %519 = shalt.err (!%p516_p0)
}
 0x225   :  { %s520_s10 = scalar_lea.hbm %s651_s5, 256 }
 0x226   :  { %p521_p1 = scmp.ne.s32.totalorder %s651_s5, %s520_s10  ;;  %p524_p2 = scmp.lt.u32.totalorder %s520_s10, %s651_s5 }
 0x228   :  { %p526_p3 = pnand %p524_p2, %p521_p1 }
 0x22a   :  { %529 = shalt.err (!%p526_p3)
}
 0x22b   :  { %s544_s15 = smov 128   ;;  %s545_s16 = smov 8  }
 0x22c   :  { %327 = dma.vmem_to_hbm [thread:$0]  %s322_s7, 256, %s651_s5, [#allocation4], %s544_s15, %s544_s15, %s545_s16  }
 0x22d   :  { %534 = dma.done.wait [#allocation4], 256  }
 0x22e   :  { %535 = vsyncadd [#allocation4], 4294967040 }
 0x22f   :  { %331 = vsyncpa [#allocation3], 1 }
 0x230   :  { %332 = vsyncpa [#allocation6], 1 }
 0x231   :  { %333 = vsyncpa [#allocation4], 1 }

// kernel: tpu_custom_call.1
= control target key start
LH: loop header
LB: loop body
LE: loop exit
PB: predicated region body
PF: predicated region fallthrough
CT: control target
= control target key end

     0   :  { %10 = vsyncpa [#allocation3], 0  ;;  %s646_s0 = inlined_call_operand.hbm [shape: bf16[16,128], index: 0, kind: input, shape index: {}]   ;;  %s647_s1 = inlined_call_operand.hbm [shape: bf16[128,128], index: 1, kind: input, shape index: {}]   ;;  %s648_s2 = inlined_call_operand.vmem [shape: f32[1,128], index: 2, kind: input, shape index: {}]   ;;  %s649_s3 = inlined_call_operand.hbm [shape: bf16[128,128], index: 3, kind: input, shape index: {}]   ;;  %s650_s4 = inlined_call_operand.vmem [shape: f32[1,128], index: 4, kind: input, shape index: {}]   ;;  %s651_s5 = inlined_call_operand.hbm [shape: f32[16,128], index: 5, kind: output, shape index: {}]  }
   0x1   :  { %11 = vsyncpa [#allocation6], 0 }
   0x2   :  { %12 = vsyncpa [#allocation4], 0  ;;  %s536_s18 = smov [#allocation5]   ;;  %s537_s20 = smov [#allocation2]  }
   0x3   :  { %s30_s19 = sshll.u32 %s536_s18, 4  ;;  %s18_s21 = sshll.u32 %s537_s20, 4  ;;  %s31_s19 = int_to_ptr.vmem [resolvable:$true] %s30_s19  ;;  %s576_s21 = int_to_ptr.vmem [resolvable:$true] %s18_s21 }
   0x4   :  { %s442_s24 = scalar_lea.hbm %s647_s1, 1024 }
   0x5   :  { %p443_p0 = scmp.ne.s32.totalorder %s647_s1, %s442_s24  ;;  %p446_p1 = scmp.lt.u32.totalorder %s442_s24, %s647_s1 }
   0x7   :  { %p448_p2 = pnand %p446_p1, %p443_p0 }
   0x9   :  { %451 = shalt.err (!%p448_p2)
}
   0xa   :  { %s452_s29 = scalar_lea.vmem %s31_s19, 1024  ;;  %p457_p4 = scmp.lt.s32.totalorder %s31_s19, %s31_s19 }
   0xb   :  { %p453_p3 = scmp.ne.s32.totalorder %s31_s19, %s452_s29  ;;  %p458_p5 = scmp.lt.s32.totalorder %s452_s29, %s452_s29 }
   0xd   :  { %p459_p6 = por %p458_p5, %p457_p4 }
   0xf   :  { %p460_p7 = pnand %p459_p6, %p453_p3 }
  0x11   :  { %463 = shalt.err (!%p460_p7)
}
  0x12   :  { %s538_s30 = smov 64   ;;  %s539_s6 = smov 4  }
  0x13   :  { %36 = dma.hbm_to_vmem [thread:$0]  %s647_s1, 1024, %s31_s19, [#allocation6], %s538_s30, %s538_s30, %s539_s6  }
  0x14   :  { %s464_s11 = scalar_lea.hbm %s646_s0, 128 }
  0x15   :  { %p465_p8 = scmp.ne.s32.totalorder %s646_s0, %s464_s11  ;;  %p468_p9 = scmp.lt.u32.totalorder %s464_s11, %s646_s0 }
  0x17   :  { %p470_p10 = pnand %p468_p9, %p465_p8 }
  0x19   :  { %473 = shalt.err (!%p470_p10)
}
  0x1a   :  { %s474_s16 = scalar_lea.vmem %s576_s21, 128  ;;  %p479_p12 = scmp.lt.s32.totalorder %s576_s21, %s576_s21 }
  0x1b   :  { %p475_p11 = scmp.ne.s32.totalorder %s576_s21, %s474_s16  ;;  %p480_p13 = scmp.lt.s32.totalorder %s474_s16, %s474_s16 }
  0x1d   :  { %p481_p0 = por %p480_p13, %p479_p12 }
  0x1f   :  { %p482_p1 = pnand %p481_p0, %p475_p11 }
  0x21   :  { %485 = shalt.err (!%p482_p1)
}
  0x22   :  { %24 = dma.hbm_to_vmem [thread:$0]  %s646_s0, 128, %s576_s21, [#allocation3], %s538_s30, %s538_s30, %s539_s6  }
  0x23   :  { %s540_s18 = smov [#allocation7]   ;;  %s486_s23 = scalar_lea.hbm %s649_s3, 1024 }
  0x24   :  { %s44_s19 = sshll.u32 %s540_s18, 4  ;;  %p487_p2 = scmp.ne.s32.totalorder %s649_s3, %s486_s23  ;;  %s45_s19 = int_to_ptr.vmem [resolvable:$true] %s44_s19 }
  0x25   :  { %p490_p3 = scmp.lt.u32.totalorder %s486_s23, %s649_s3 }
  0x27   :  { %p492_p4 = pnand %p490_p3, %p487_p2 }
  0x29   :  { %495 = shalt.err (!%p492_p4)
}
  0x2a   :  { %s496_s28 = scalar_lea.vmem %s45_s19, 1024  ;;  %p501_p6 = scmp.lt.s32.totalorder %s45_s19, %s45_s19 }
  0x2b   :  { %p497_p5 = scmp.ne.s32.totalorder %s45_s19, %s496_s28  ;;  %p502_p7 = scmp.lt.s32.totalorder %s496_s28, %s496_s28 }
  0x2d   :  { %p503_p8 = por %p502_p7, %p501_p6 }
  0x2f   :  { %p504_p9 = pnand %p503_p8, %p497_p5 }
  0x31   :  { %507 = shalt.err (!%p504_p9)
}
  0x32   :  { %50 = dma.hbm_to_vmem [thread:$0]  %s649_s3, 1024, %s45_s19, [#allocation6], %s538_s30, %s538_s30, %s539_s6  }
  0x33   :  { %530 = dma.done.wait [#allocation3], 128  }
  0x34   :  { %531 = vsyncadd [#allocation3], 4294967168 }
  0x35   :  { %532 = dma.done.wait [#allocation6], 2048  }
  0x36   :  { %533 = vsyncadd [#allocation6], 4294965248  ;;  %v541_v0 = vmov 0.0   ;;  %vm542_vm0 = vmmov 0   ;;  %v421_v1 = vld [vmem:[#allocation5] sm:$0xff]   ;;  %v422_v2 = vld [vmem:[#allocation5 + $0x8] sm:$0xff]  }
  0x37   :  { %371 = vmatprep.subr.bf16.mxu0 %v541_v0  ;;  %387 = vmatprep.mubr.msk.bf16.mxu0 %vm542_vm0, %v541_v0  ;;  %v423_v3 = vld [vmem:[#allocation5 + $0x10] sm:$0xff]   ;;  %v424_v4 = vld [vmem:[#allocation5 + $0x18] sm:$0xff]   ;;  %v425_v5 = vld [vmem:[#allocation5 + $0x20] sm:$0xff]   ;;  %s543_s6 = smov [#allocation8]  }
  0x38   :  { %391 = vmatprep.subr.bf16.mxu1 %v541_v0  ;;  %407 = vmatprep.mubr.msk.bf16.mxu1 %vm542_vm0, %v541_v0  ;;  %v426_v6 = vld [vmem:[#allocation5 + $0x28] sm:$0xff]   ;;  %v427_v7 = vld [vmem:[#allocation5 + $0x30] sm:$0xff]   ;;  %v428_v8 = vld [vmem:[#allocation5 + $0x38] sm:$0xff]   ;;  %s321_s7 = sshll.u32 %s543_s6, 4  ;;  %s322_s7 = int_to_ptr.vmem [resolvable:$true] %s321_s7 }
  0x39   :  { %372 = vmatpush3.bf16.msra.mxu0 %v421_v1  ;;  %v429_v9 = vld [vmem:[#allocation2] sm:$0xff]   ;;  %v430_v10 = vld [vmem:[#allocation7] sm:$0xff]   ;;  %v431_v11 = vld [vmem:[#allocation7 + $0x8] sm:$0xff]   ;;  %s508_s8 = scalar_lea.vmem %s322_s7, 256  ;;  %p513_p11 = scmp.lt.s32.totalorder %s322_s7, %s322_s7 }
  0x3a   :  { %373 = vmatprep.subr.bf16.mxu0 %v541_v0  ;;  %392 = vmatpush3.bf16.msra.mxu1 %v430_v10  ;;  %v432_v12 = vld [vmem:[#allocation7 + $0x10] sm:$0xff]   ;;  %v433_v13 = vld [vmem:[#allocation7 + $0x18] sm:$0xff]   ;;  %v434_v14 = vld [vmem:[#allocation7 + $0x20] sm:$0xff]   ;;  %p509_p10 = scmp.ne.s32.totalorder %s322_s7, %s508_s8  ;;  %p514_p12 = scmp.lt.s32.totalorder %s508_s8, %s508_s8 }
  0x3b   :  { %393 = vmatprep.subr.bf16.mxu1 %v541_v0  ;;  %v435_v15 = vld [vmem:[#allocation7 + $0x28] sm:$0xff]   ;;  %v436_v16 = vld [vmem:[#allocation7 + $0x30] sm:$0xff]   ;;  %v437_v17 = vld [vmem:[#allocation7 + $0x38] sm:$0xff]  }
  0x3c   :  { %v334_v18 = vld [vmem:[%s648_s2] ss:$0 sm:$0xff]  ;;  %p515_p13 = por %p514_p12, %p513_p11 }
  0x3d   :  { %374 = vmatpush3.bf16.msra.mxu0 %v422_v2  ;;  %v344_v44 = vld [vmem:[%s650_s4] ss:$0 sm:$0xff] }
  0x3e   :  { %375 = vmatprep.subr.bf16.mxu0 %v541_v0  ;;  %394 = vmatpush3.bf16.msra.mxu1 %v431_v11  ;;  %p516_p0 = pnand %p515_p13, %p509_p10 }
  0x3f   :  { %395 = vmatprep.subr.bf16.mxu1 %v541_v0 }
  0x41   :  { %376 = vmatpush3.bf16.msra.mxu0 %v423_v3 }
  0x42   :  { %377 = vmatprep.subr.bf16.mxu0 %v541_v0  ;;  %396 = vmatpush3.bf16.msra.mxu1 %v432_v12 }
  0x43   :  { %397 = vmatprep.subr.bf16.mxu1 %v541_v0 }
  0x45   :  { %378 = vmatpush3.bf16.msra.mxu0 %v424_v4 }
  0x46   :  { %379 = vmatprep.subr.bf16.mxu0 %v541_v0  ;;  %398 = vmatpush3.bf16.msra.mxu1 %v433_v13 }
  0x47   :  { %399 = vmatprep.subr.bf16.mxu1 %v541_v0 }
  0x49   :  { %380 = vmatpush3.bf16.msra.mxu0 %v425_v5 }
  0x4a   :  { %381 = vmatprep.subr.bf16.mxu0 %v541_v0  ;;  %400 = vmatpush3.bf16.msra.mxu1 %v434_v14 }
  0x4b   :  { %401 = vmatprep.subr.bf16.mxu1 %v541_v0 }
  0x4d   :  { %382 = vmatpush3.bf16.msra.mxu0 %v426_v6 }
  0x4e   :  { %383 = vmatprep.subr.bf16.mxu0 %v541_v0  ;;  %402 = vmatpush3.bf16.msra.mxu1 %v435_v15 }
  0x4f   :  { %403 = vmatprep.subr.bf16.mxu1 %v541_v0 }
  0x51   :  { %384 = vmatpush3.bf16.msra.mxu0 %v427_v7 }
  0x52   :  { %385 = vmatprep.subr.bf16.mxu0 %v541_v0  ;;  %404 = vmatpush3.bf16.msra.mxu1 %v436_v16 }
  0x53   :  { %405 = vmatprep.subr.bf16.mxu1 %v541_v0 }
  0x55   :  { %386 = vmatpush3.bf16.msra.mxu0 %v428_v8 }
  0x56   :  { %406 = vmatpush3.bf16.msra.mxu1 %v437_v17 }
  0x58   :  { %388 = vmatmul.mubr.bf16.vlgmr.msra.gmra.mrb[0].mxu0 %v429_v9 }
 0x12b   :  { %v176_v19 = vpop.f32.mrb[0].mxu0 }
 0x12c   :  { %v177_v20 = vadd.f32 %v334_v18, %v176_v19  ;;  %v389_v21 = vpop.f32.mrb[1].mxu0 }
 0x12d   :  { %v179_v22 = vpop.f32.mrb[2].mxu0 }
 0x12e   :  { %v185_v23 = vmul.f32 0.044715, %v177_v20  ;;  %v180_v24 = vadd.f32 %v334_v18, %v179_v22  ;;  %v390_v25 = vpop.f32.mrb[3].mxu0  ;;  %v183_v38 = vmul.f32 0.5, %v177_v20 }
 0x130   :  { %v187_v26 = vmul.f32 %v185_v23, %v177_v20  ;;  %v186_v27 = vmul.f32 0.044715, %v180_v24  ;;  %v184_v39 = vmul.f32 0.5, %v180_v24 }
 0x132   :  { %v189_v28 = vmul.f32 %v187_v26, %v177_v20  ;;  %v188_v29 = vmul.f32 %v186_v27, %v180_v24 }
 0x134   :  { %v190_v30 = vmul.f32 %v188_v29, %v180_v24  ;;  %v191_v31 = vadd.f32 %v189_v28, %v177_v20 }
 0x136   :  { %v192_v32 = vadd.f32 %v190_v30, %v180_v24  ;;  %v193_v33 = vmul.f32 0.7978846, %v191_v31 }
 0x138   :  { %v194_v34 = vmul.f32 0.7978846, %v192_v32  ;;  %438 = vtanh.f32 %v193_v33 }
 0x13a   :  { %440 = vtanh.f32 %v194_v34 }
 0x142   :  { %v439_v35 = vpop.eup %438 }
 0x143   :  { %v197_v36 = vadd.f32 1.0, %v439_v35 }
 0x144   :  { %v441_v37 = vpop.eup %440 }
 0x145   :  { %v198_v40 = vadd.f32 1.0, %v441_v37  ;;  %v199_v41 = vmul.f32 %v197_v36, %v183_v38 }
 0x147   :  { %v200_v42 = vmul.f32 %v198_v40, %v184_v39 }
 0x149   :  { %v201_v43 = vpack.c.bf16 %v200_v42, %v199_v41 }
 0x14b   :  { %408 = vmatmul.mubr.bf16.vlgmr.msra.gmra.mrb[0].mxu1 %v201_v43 }
 0x21e   :  { %v307_v45 = vpop.f32.mrb[0].mxu1 }
 0x21f   :  { %v308_v46 = vadd.f32 %v344_v44, %v307_v45  ;;  %v409_v47 = vpop.f32.mrb[1].mxu1 }
 0x220   :  { %v310_v48 = vpop.f32.mrb[2].mxu1 }
 0x221   :  { %314 = vst [vmem:[#allocation8] sm:$0xff] %v308_v46  ;;  %v311_v49 = vadd.f32 %v344_v44, %v310_v48  ;;  %v410_v50 = vpop.f32.mrb[3].mxu1 }
 0x223   :  { %315 = vst [vmem:[#allocation8 + $0x8] sm:$0xff] %v311_v49 }
 0x224   :  { %519 = shalt.err (!%p516_p0)
}
 0x225   :  { %s520_s10 = scalar_lea.hbm %s651_s5, 256 }
 0x226   :  { %p521_p1 = scmp.ne.s32.totalorder %s651_s5, %s520_s10  ;;  %p524_p2 = scmp.lt.u32.totalorder %s520_s10, %s651_s5 }
 0x228   :  { %p526_p3 = pnand %p524_p2, %p521_p1 }
 0x22a   :  { %529 = shalt.err (!%p526_p3)
}
 0x22b   :  { %s544_s15 = smov 128   ;;  %s545_s16 = smov 8  }
 0x22c   :  { %327 = dma.vmem_to_hbm [thread:$0]  %s322_s7, 256, %s651_s5, [#allocation4], %s544_s15, %s544_s15, %s545_s16  }
 0x22d   :  { %534 = dma.done.wait [#allocation4], 256  }
 0x22e   :  { %535 = vsyncadd [#allocation4], 4294967040 }
 0x22f   :  { %331 = vsyncpa [#allocation3], 1 }
 0x230   :  { %332 = vsyncpa [#allocation6], 1 }
 0x231   :  { %333 = vsyncpa [#allocation4], 1 }

</bundles_post_ra>
